<compile_context>
chip_gen: v7x
topology: tpu7x:2x2x1
jax: 0.10.0
libtpu: 0.0.40
codegen_flags: <defaults>
</compile_context>

<pallas_src>
import functools

import jax
import jax.numpy as jnp
from jax.experimental import pallas as pl
from jax.experimental.pallas import tpu as pltpu

EPS = 1e-5

_MIB = 1024 * 1024
_MIN_TILE_BYTES = 2 * _MIB    # keep per-step input tiles >= 2 MiB (amortize ~0.35us/step)
_TARGET_GRID_STEPS = 4        # allow megacore sharding of the row axis on v7x


def _cdiv(a, b):
    return -(-a // b)


def _round_up(x, m):
    return _cdiv(x, m) * m


def _sublanes(dtype):
    return 16 if jnp.dtype(dtype).itemsize == 2 else 8


@functools.lru_cache(maxsize=None)
def _vmem_budget_bytes():
    """Return (scoped vmem_limit_bytes, per-step tile-sizing budget) for this chip."""
    try:
        kind = jax.devices()[0].device_kind.lower()
    except Exception:  # pragma: no cover - defensive
        kind = ""
    try:
        reported = int(getattr(pltpu.get_tpu_info(), "vmem_capacity_bytes", 0) or 0)
    except Exception:  # pragma: no cover - defensive (no TPU / old jax)
        reported = 0

    if reported > 0:
        cap = reported
    elif "v5" in kind or "v6" in kind or "v4" in kind:
        cap = 128 * _MIB
    else:
        cap = 64 * _MIB
    # Some stacks report per-chip VMEM; v7x only has 64 MiB per TensorCore.
    # Only trust values above 64 MiB on known 128 MiB-per-core parts.
    if cap > 64 * _MIB and not ("v4" in kind or "v5" in kind or "v6" in kind):
        cap = 64 * _MIB

    limit = (cap * 3) // 4     # scoped VMEM limit, headroom under physical
    budget = (limit * 4) // 5  # tile-sizing budget, headroom for Mosaic scratch
    return limit, budget


def _pick_block_rows(n_rows, d, dtype, budget_bytes):
    """Largest sublane-aligned row tile fitting the budget, with >=4 grid steps
    when tiles stay above the minimum size (for v7x TensorCore sharding)."""
    sub = _sublanes(dtype)
    itemsize = jnp.dtype(dtype).itemsize
    # Per row: double-buffered input + output tiles plus ~3 full-tile f32
    # temporaries (x32, centered x, broadcast inv*weight).  The low-precision
    # path uses less; the conservative estimate costs little tile size.
    per_row_bytes = 4 * d * itemsize + 12 * d
    rows_rounded = _round_up(n_rows, sub)

    br = max(sub, (budget_bytes // per_row_bytes) // sub * sub)
    br = min(br, rows_rounded)

    # If the whole problem fits in one tile, still split into a few grid steps
    # so v7x can shard the parallel row axis across both TensorCores, but never
    # shrink tiles below the minimum bytes (per-step overhead would dominate).
    min_tile_rows = _round_up(max(sub, _cdiv(_MIN_TILE_BYTES, d * itemsize)), sub)
    split_rows = _round_up(_cdiv(rows_rounded, _TARGET_GRID_STEPS), sub)
    if split_rows >= min_tile_rows:
        br = min(br, split_rows)

    return max(sub, br)


def _layernorm_kernel(x_ref, w_ref, b_ref, o_ref, *, fast_lowp):
    # x_ref: (block_rows, D)   w_ref/b_ref: (1, D)   o_ref: (block_rows, D)
    x = x_ref[...]
    w = w_ref[...]
    b = b_ref[...]
    if fast_lowp:
        # bf16/f16 input: one-pass statistics in f32, final scale-shift in the
        # input dtype (halves VALU cost per element; v7x bf16 is ~VALU-bound).
        d = x.shape[-1]
        x32 = x.astype(jnp.float32)
        mean = jnp.sum(x32, axis=-1, keepdims=True) * (1.0 / d)
        msq = jnp.sum(x32 * x32, axis=-1, keepdims=True) * (1.0 / d)
        var = jnp.maximum(msq - mean * mean, 0.0)   # biased variance (torch)
        inv = jax.lax.rsqrt(var + EPS)
        scale = inv.astype(x.dtype) * w.astype(x.dtype)      # (rows, D) low-precision
        o_ref[...] = ((x - mean.astype(x.dtype)) * scale
                      + b.astype(x.dtype)).astype(o_ref.dtype)
    else:
        # f32 input: two-pass centered variance (numerically stable).
        x32 = x.astype(jnp.float32)
        mean = jnp.mean(x32, axis=-1, keepdims=True)
        xc = x32 - mean
        var = jnp.mean(xc * xc, axis=-1, keepdims=True)       # biased variance (torch)
        inv = jax.lax.rsqrt(var + EPS)
        # NOTE: (inv * w) broadcasts to a full (rows, D) f32 temp; the per-row
        # VMEM estimate in _pick_block_rows budgets for it.
        o_ref[...] = (xc * (inv * w.astype(jnp.float32))
                      + b.astype(jnp.float32)).astype(o_ref.dtype)


@functools.partial(jax.jit, static_argnames=("block_rows",))
def layer_norm(x, weight, bias, block_rows=None):
    """LayerNorm over the last dim of x. x: (..., D); weight/bias: (D,)."""
    orig_shape = x.shape
    d = orig_shape[-1]
    x2 = x.reshape(-1, d)
    n_rows = x2.shape[0]

    vmem_limit, tile_budget = _vmem_budget_bytes()
    if block_rows is None:
        block_rows = _pick_block_rows(n_rows, d, x.dtype, tile_budget)
    sub = _sublanes(x.dtype)
    assert block_rows % sub == 0, "block_rows must be a sublane multiple"

    w2 = weight.reshape(1, d)
    b2 = bias.reshape(1, d)

    # Ragged row counts: no wrapper-side pad/slice (each is an extra HBM pass).
    # Pallas masks the boundary block's out-of-bounds stores; OOB input rows are
    # garbage but each row's LayerNorm is independent, so they never leak.
    grid = (_cdiv(n_rows, block_rows),)
    fast_lowp = jnp.dtype(x.dtype).itemsize == 2

    out = pl.pallas_call(
        functools.partial(_layernorm_kernel, fast_lowp=fast_lowp),
        out_shape=jax.ShapeDtypeStruct((n_rows, d), x.dtype),
        grid_spec=pltpu.PrefetchScalarGridSpec(
            num_scalar_prefetch=0,
            grid=grid,
            in_specs=[
                pl.BlockSpec((block_rows, d), lambda i: (i, 0)),
                # Constant block index: Pallas keeps weight/bias resident.
                pl.BlockSpec((1, d), lambda i: (0, 0)),
                pl.BlockSpec((1, d), lambda i: (0, 0)),
            ],
            out_specs=pl.BlockSpec((block_rows, d), lambda i: (i, 0)),
        ),
        compiler_params=pltpu.CompilerParams(
            dimension_semantics=("parallel",),
            vmem_limit_bytes=vmem_limit,
        ),
    )(x2, w2, b2)

    return out.reshape(orig_shape)


def _ref_layer_norm(x, weight, bias):
    x32 = x.astype(jnp.float32)
    mean = jnp.mean(x32, axis=-1, keepdims=True)
    var = jnp.mean((x32 - mean) ** 2, axis=-1, keepdims=True)
    y = (x32 - mean) * jax.lax.rsqrt(var + EPS) * weight.astype(jnp.float32) \
        + bias.astype(jnp.float32)
    return y.astype(x.dtype)


if __name__ == "__main__":
    # Module __init__: weight = ones(ndim), bias = zeros(ndim) (bias=True).
    # Deterministic "trained-like" params derived in-script for a non-trivial test.
    key = jax.random.PRNGKey(0)
    kx, kw, kb, kx2, kx3, kw3, kb3 = jax.random.split(key, 7)

    # Test 1: small f32 case (batch=2, seq=8, hidden=32), single tile.
    B, T, D = 2, 8, 32
    x = jax.random.normal(kx, (B, T, D), dtype=jnp.float32)
    weight = jnp.ones((D,), jnp.float32) + 0.1 * jax.random.normal(kw, (D,), jnp.float32)
    bias = 0.1 * jax.random.normal(kb, (D,), jnp.float32)
    y = jax.block_until_ready(layer_norm(x, weight, bias))
    y_ref = _ref_layer_norm(x, weight, bias)
    assert jnp.allclose(y, y_ref, atol=1e-5, rtol=1e-5), "mismatch vs reference (test 1)"

    # Test 2: ragged row count + multi-step grid with boundary masking
    # (150 rows, block_rows=64 -> grid of 3, last block partially out of bounds).
    B2, T2, D2 = 3, 50, 128
    x2 = jax.random.normal(kx2, (B2, T2, D2), dtype=jnp.float32)
    w2 = jnp.ones((D2,), jnp.float32)
    b2 = jnp.zeros((D2,), jnp.float32)
    y2 = jax.block_until_ready(layer_norm(x2, w2, b2, block_rows=64))
    y2_ref = _ref_layer_norm(x2, w2, b2)
    assert jnp.allclose(y2, y2_ref, atol=1e-5, rtol=1e-5), "mismatch vs reference (test 2)"

    # Test 3: bf16 fast path (one-pass stats, low-precision scale/shift),
    # f32 params as in mixed-precision GPT training.
    B3, T3, D3 = 2, 64, 128
    x3 = jax.random.normal(kx3, (B3, T3, D3), dtype=jnp.float32).astype(jnp.bfloat16)
    w3 = jnp.ones((D3,), jnp.float32) + 0.05 * jax.random.normal(kw3, (D3,), jnp.float32)
    b3 = 0.05 * jax.random.normal(kb3, (D3,), jnp.float32)
    y3 = jax.block_until_ready(layer_norm(x3, w3, b3))
    y3_ref = _ref_layer_norm(x3, w3, b3)
    assert jnp.allclose(y3.astype(jnp.float32), y3_ref.astype(jnp.float32),
                        atol=1e-1, rtol=5e-2), "mismatch vs reference (test 3, bf16)"

    print("KERNEL_OK")
</pallas_src>

<mosaic_0001>
module attributes {stable_mosaic.version = 11 : i64} {
  func.func @_layernorm_kernel(%arg0: i32, %arg1: memref<16x32xf32, #tpu.memory_space<vmem>>, %arg2: memref<1x32xf32, #tpu.memory_space<vmem>>, %arg3: memref<1x32xf32, #tpu.memory_space<vmem>>, %arg4: memref<16x32xf32, #tpu.memory_space<vmem>>) attributes {dimension_semantics = [#tpu.dimension_semantics<parallel>], iteration_bounds = array<i64: 1>, scalar_prefetch = 0 : i64, scratch_operands = 0 : i64, tpu.core_type = #tpu.core_type<tc>, window_params = [{transform_indices = @transform_0, window_bounds = array<i64: 16, 32>}, {pipeline_mode = #tpu.pipeline_mode<synchronous>, transform_indices = @transform_1, window_bounds = array<i64: 1, 32>}, {pipeline_mode = #tpu.pipeline_mode<synchronous>, transform_indices = @transform_2, window_bounds = array<i64: 1, 32>}, {transform_indices = @transform_3, window_bounds = array<i64: 16, 32>}]} {
    %c0 = arith.constant 0 : index
    %c0_0 = arith.constant 0 : index
    %0 = vector.load %arg1[%c0, %c0_0] : memref<16x32xf32, #tpu.memory_space<vmem>>, vector<16x32xf32>
    %c0_1 = arith.constant 0 : index
    %c0_2 = arith.constant 0 : index
    %1 = vector.load %arg2[%c0_1, %c0_2] : memref<1x32xf32, #tpu.memory_space<vmem>>, vector<1x32xf32>
    %c0_3 = arith.constant 0 : index
    %c0_4 = arith.constant 0 : index
    %2 = vector.load %arg3[%c0_3, %c0_4] : memref<1x32xf32, #tpu.memory_space<vmem>>, vector<1x32xf32>
    %cst = arith.constant dense<0.000000e+00> : vector<16xf32>
    %3 = vector.multi_reduction <add>, %0, %cst [1] : vector<16x32xf32> to vector<16xf32>
    %4 = vector.shape_cast %3 : vector<16xf32> to vector<16x1xf32>
    %cst_5 = arith.constant 3.200000e+01 : f32
    %5 = vector.broadcast %cst_5 : f32 to vector<16x1xf32>
    %6 = arith.divf %4, %5 : vector<16x1xf32>
    %7 = vector.broadcast %6 : vector<16x1xf32> to vector<16x32xf32>
    %8 = arith.subf %0, %7 : vector<16x32xf32>
    %9 = arith.mulf %8, %8 : vector<16x32xf32>
    %cst_6 = arith.constant dense<0.000000e+00> : vector<16xf32>
    %10 = vector.multi_reduction <add>, %9, %cst_6 [1] : vector<16x32xf32> to vector<16xf32>
    %11 = vector.shape_cast %10 : vector<16xf32> to vector<16x1xf32>
    %cst_7 = arith.constant 3.200000e+01 : f32
    %12 = vector.broadcast %cst_7 : f32 to vector<16x1xf32>
    %13 = arith.divf %11, %12 : vector<16x1xf32>
    %cst_8 = arith.constant 9.99999974E-6 : f32
    %14 = vector.broadcast %cst_8 : f32 to vector<16x1xf32>
    %15 = arith.addf %13, %14 : vector<16x1xf32>
    %16 = math.rsqrt %15 : vector<16x1xf32>
    %17 = vector.broadcast %16 : vector<16x1xf32> to vector<16x32xf32>
    %18 = vector.broadcast %1 : vector<1x32xf32> to vector<16x32xf32>
    %19 = arith.mulf %17, %18 : vector<16x32xf32>
    %20 = arith.mulf %8, %19 : vector<16x32xf32>
    %21 = vector.broadcast %2 : vector<1x32xf32> to vector<16x32xf32>
    %22 = arith.addf %20, %21 : vector<16x32xf32>
    %c0_9 = arith.constant 0 : index
    %c0_10 = arith.constant 0 : index
    %23 = vector.load %arg4[%c0_9, %c0_10] : memref<16x32xf32, #tpu.memory_space<vmem>>, vector<16x32xf32>
    tpu.vector_store %arg4[%c0_9, %c0_10], %22 {strides = array<i32>} : memref<16x32xf32, #tpu.memory_space<vmem>>, vector<16x32xf32>,
    return
  }
  func.func @transform_0(%arg0: i32) -> (i32, i32) {
    %c0_i32 = arith.constant 0 : i32
    %c0_i32_0 = arith.constant 0 : i32
    return %arg0, %c0_i32 : i32, i32
  }
  func.func @transform_1(%arg0: i32) -> (i32, i32) {
    %c0_i32 = arith.constant 0 : i32
    %c0_i32_0 = arith.constant 0 : i32
    %c0_i32_1 = arith.constant 0 : i32
    return %c0_i32, %c0_i32_0 : i32, i32
  }
  func.func @transform_2(%arg0: i32) -> (i32, i32) {
    %c0_i32 = arith.constant 0 : i32
    %c0_i32_0 = arith.constant 0 : i32
    %c0_i32_1 = arith.constant 0 : i32
    return %c0_i32, %c0_i32_0 : i32, i32
  }
  func.func @transform_3(%arg0: i32) -> (i32, i32) {
    %c0_i32 = arith.constant 0 : i32
    %c0_i32_0 = arith.constant 0 : i32
    return %arg0, %c0_i32 : i32, i32
  }
}

</mosaic_0001>

<bundles_post_ra>
// kernel: layer_norm.1
= control target key start
LH: loop header
LB: loop body
LE: loop exit
PB: predicated region body
PF: predicated region fallthrough
CT: control target
= control target key end

     0   :  { %8 = vsyncpa [#allocation3], 0  ;;  %s220_s0 = inlined_call_operand.hbm [shape: f32[16,32], index: 0, kind: input, shape index: {}]   ;;  %s221_s1 = inlined_call_operand.vmem [shape: f32[1,32], index: 1, kind: input, shape index: {}]   ;;  %s222_s2 = inlined_call_operand.vmem [shape: f32[1,32], index: 2, kind: input, shape index: {}]   ;;  %s223_s3 = inlined_call_operand.hbm [shape: f32[16,32], index: 3, kind: output, shape index: {}]  }
   0x1   :  { %9 = vsyncpa [#allocation4], 0  ;;  %s154_s12 = smov [#allocation2]   ;;  %s106_s16 = scalar_lea.hbm %s220_s0, 256 }
   0x2   :  { %s15_s13 = sshll.u32 %s154_s12, 4  ;;  %p107_p0 = scmp.ne.s32.totalorder %s220_s0, %s106_s16  ;;  %s16_s13 = int_to_ptr.vmem [resolvable:$true] %s15_s13 }
   0x3   :  { %p110_p1 = scmp.lt.u32.totalorder %s106_s16, %s220_s0 }
   0x5   :  { %p112_p2 = pnand %p110_p1, %p107_p0 }
   0x7   :  { %115 = shalt.err (!%p112_p2)
}
   0x8   :  { %s116_s21 = scalar_lea.vmem %s16_s13, 256  ;;  %p121_p4 = scmp.lt.s32.totalorder %s16_s13, %s16_s13 }
   0x9   :  { %p117_p3 = scmp.ne.s32.totalorder %s16_s13, %s116_s21  ;;  %p122_p5 = scmp.lt.s32.totalorder %s116_s21, %s116_s21 }
   0xb   :  { %p123_p6 = por %p122_p5, %p121_p4 }
   0xd   :  { %p124_p7 = pnand %p123_p6, %p117_p3 }
   0xf   :  { %127 = shalt.err (!%p124_p7)
}
  0x10   :  { %s155_s22 = smov 128   ;;  %s156_s23 = smov 8  }
  0x11   :  { %21 = dma.hbm_to_vmem [thread:$0]  %s220_s0, 256, %s16_s13, [#allocation3], %s155_s22, %s155_s22, %s156_s23  }
  0x12   :  { %150 = dma.done.wait [#allocation3], 256  }
  0x13   :  { %151 = vsyncadd [#allocation3], 4294967040  ;;  %vm33_vm0 = vcmask 261120   ;;  %v29_v0 = vld [vmem:[#allocation2] sm:$0xff]  ;;  %v30_v1 = vld [vmem:[#allocation2 + $0x8] sm:$0xff]  ;;  %s157_s29 = smov [#allocation5]  }
  0x14   :  { %v34_v2 = vsel %vm33_vm0, %v29_v0, 0.0  ;;  %v37_v3 = vsel %vm33_vm0, %v30_v1, 0.0  ;;  %v96_v20 = vld [vmem:[%s221_s1] ss:$0 sm:$0xff]  ;;  %s84_s30 = sshll.u32 %s157_s29, 4  ;;  %s85_s30 = int_to_ptr.vmem [resolvable:$true] %s84_s30 }
  0x15   :  { %35 = vadd.xlane.f32.xlu0 %v34_v2  ;;  %v97_v23 = vld [vmem:[%s222_s2] ss:$0 sm:$0xff]  ;;  %s128_s1 = scalar_lea.vmem %s85_s30, 256  ;;  %p133_p9 = scmp.lt.s32.totalorder %s85_s30, %s85_s30 }
  0x16   :  { %p129_p8 = scmp.ne.s32.totalorder %s85_s30, %s128_s1  ;;  %p134_p10 = scmp.lt.s32.totalorder %s128_s1, %s128_s1 }
  0x18   :  { %p135_p11 = por %p134_p10, %p133_p9 }
  0x19   :  { %38 = vadd.xlane.f32.xlu0 %v37_v3 }
  0x1a   :  { %p136_p12 = pnand %p135_p11, %p129_p8 }
  0xa2   :  { %v36_v4 = vpop.xlane.xlu0 %35 }
  0xa3   :  { %v41_v5 = vmul.f32 0.03125, %v36_v4 }
  0xa5   :  { %v43_v6 = vsub.f32 %v29_v0, %v41_v5 }
  0xa6   :  { %v39_v7 = vpop.xlane.xlu0 %38 }
  0xa7   :  { %v42_v8 = vmul.f32 0.03125, %v39_v7  ;;  %v45_v9 = vmul.f32 %v43_v6, %v43_v6 }
  0xa9   :  { %v44_v10 = vsub.f32 %v30_v1, %v42_v8  ;;  %v47_v11 = vsel %vm33_vm0, %v45_v9, 0.0 }
  0xaa   :  { %48 = vadd.xlane.f32.xlu1 %v47_v11 }
  0xab   :  { %v46_v12 = vmul.f32 %v44_v10, %v44_v10 }
  0xad   :  { %v50_v13 = vsel %vm33_vm0, %v46_v12, 0.0 }
  0xae   :  { %51 = vadd.xlane.f32.xlu1 %v50_v13 }
 0x137   :  { %v49_v14 = vpop.xlane.xlu1 %48 }
 0x138   :  { %v53_v15 = vmul.f32 0.03125, %v49_v14 }
 0x13a   :  { %v55_v16 = vadd.f32 1e-05, %v53_v15 }
 0x13b   :  { %v52_v17 = vpop.xlane.xlu1 %51 }
 0x13c   :  { %102 = vrsqrt.f32 %v55_v16  ;;  %v54_v18 = vmul.f32 0.03125, %v52_v17 }
 0x13e   :  { %v56_v19 = vadd.f32 1e-05, %v54_v18 }
 0x140   :  { %104 = vrsqrt.f32 %v56_v19 }
 0x146   :  { %v103_v21 = vpop.eup %102 }
 0x147   :  { %v65_v22 = vmul.f32 %v103_v21, %v96_v20 }
 0x149   :  { %v67_v24 = vmul.f32 %v65_v22, %v43_v6 }
 0x14a   :  { %v105_v25 = vpop.eup %104 }
 0x14b   :  { %v66_v26 = vmul.f32 %v105_v25, %v96_v20  ;;  %v75_v27 = vadd.f32 %v97_v23, %v67_v24 }
 0x14d   :  { %v68_v28 = vmul.f32 %v66_v26, %v44_v10  ;;  %77 = vst.msk [vmem:[#allocation5] sm:$0xff] %vm33_vm0, %v75_v27 }
 0x14f   :  { %v76_v29 = vadd.f32 %v97_v23, %v68_v28 }
 0x151   :  { %78 = vst.msk [vmem:[#allocation5 + $0x8] sm:$0xff] %vm33_vm0, %v76_v29 }
 0x152   :  { %139 = shalt.err (!%p136_p12)
}
 0x153   :  { %s140_s5 = scalar_lea.hbm %s223_s3, 256 }
 0x154   :  { %p141_p13 = scmp.ne.s32.totalorder %s223_s3, %s140_s5  ;;  %p144_p0 = scmp.lt.u32.totalorder %s140_s5, %s223_s3 }
 0x156   :  { %p146_p1 = pnand %p144_p0, %p141_p13 }
 0x158   :  { %149 = shalt.err (!%p146_p1)
}
 0x159   :  { %90 = dma.vmem_to_hbm [thread:$0]  %s85_s30, 256, %s223_s3, [#allocation4], %s155_s22, %s155_s22, %s156_s23  }
 0x15a   :  { %152 = dma.done.wait [#allocation4], 256  }
 0x15b   :  { %153 = vsyncadd [#allocation4], 4294967040 }
 0x15c   :  { %94 = vsyncpa [#allocation3], 1 }
 0x15d   :  { %95 = vsyncpa [#allocation4], 1 }

</bundles_post_ra>
